<compile_context>
chip_gen: v7x
topology: tpu7x:2x2x1
jax: 0.10.0
libtpu: 0.0.40
codegen_flags: <defaults>
</compile_context>

<pallas_src>
import functools

import jax
import jax.numpy as jnp
from jax.experimental import pallas as pl
from jax.experimental.pallas import tpu as pltpu

EPS = 1e-5  # nn.InstanceNorm1d default
LANES = 128
SUBLANES = 8


def _chip_config():
    """Return (vmem_limit_bytes, two_tensorcores, target_hbm_tile_bytes)."""
    vmem_cap = None
    try:
        vmem_cap = int(getattr(pltpu.get_tpu_info(), "vmem_capacity_bytes", 0)) or None
    except Exception:
        vmem_cap = None
    if vmem_cap is None:
        try:
            kind = jax.devices()[0].device_kind.lower()
        except Exception:
            kind = ""
        # v7x: 64 MiB VMEM per TensorCore, 2 TCs/chip; v5e/v6e: 128 MiB, 1 TC.
        vmem_cap = 64 * 1024 * 1024 if "7" in kind else 128 * 1024 * 1024
    if vmem_cap <= 96 * 1024 * 1024:
        # v7x-class: small per-core VMEM, 2 TensorCores -> modest tiles.
        return 32 * 1024 * 1024, True, 2 * 1024 * 1024
    # v5e / v6e: 128 MiB VMEM, 1 TensorCore -> bigger tiles, fewer grid steps.
    return 64 * 1024 * 1024, False, 4 * 1024 * 1024


# --------------------------------------------------------------------------
# Single-pass kernel: the whole sequence axis S lives in one block.
# --------------------------------------------------------------------------
def _add_instnorm_kernel(x1_ref, x2_ref, gamma_ref, beta_ref, o_ref):
    # x1_ref, x2_ref, o_ref: (TB, S, TD) tiles; gamma_ref, beta_ref: (1, TD)
    x = x1_ref[...].astype(jnp.float32) + x2_ref[...].astype(jnp.float32)

    # Per-(sample, channel) statistics over the sequence axis S (biased var,
    # numerically safe centered two-pass form).
    mean = jnp.mean(x, axis=1, keepdims=True)                      # (TB, 1, TD)
    var = jnp.mean(jnp.square(x - mean), axis=1, keepdims=True)    # (TB, 1, TD)

    gamma = gamma_ref[...].astype(jnp.float32)[:, None, :]         # (1, 1, TD)
    beta = beta_ref[...].astype(jnp.float32)[:, None, :]           # (1, 1, TD)

    # Fold normalization + affine into a single scale/shift FMA pass.
    scale = gamma * jax.lax.rsqrt(var + EPS)
    shift = beta - mean * scale

    o_ref[...] = (x * scale + shift).astype(o_ref.dtype)


# --------------------------------------------------------------------------
# Two-pass fallback for long sequences (S does not fit one block).
# --------------------------------------------------------------------------
def _stats_kernel(x1_ref, x2_ref, gamma_ref, beta_ref, scale_ref, shift_ref,
                  sum_ref, sq_ref, *, seq_len, ts):
    s = pl.program_id(2)

    @pl.when(s == 0)
    def _():
        sum_ref[...] = jnp.zeros_like(sum_ref)
        sq_ref[...] = jnp.zeros_like(sq_ref)

    x = x1_ref[...].astype(jnp.float32) + x2_ref[...].astype(jnp.float32)
    if seq_len % ts != 0:
        # Ragged tail S block: zero out rows past the true sequence length so
        # they do not pollute the running sums.
        rows = s * ts + jax.lax.broadcasted_iota(jnp.int32, x.shape, 1)
        x = jnp.where(rows < seq_len, x, 0.0)

    sum_ref[...] += jnp.sum(x, axis=1, keepdims=True)
    sq_ref[...] += jnp.sum(x * x, axis=1, keepdims=True)

    @pl.when(s == pl.num_programs(2) - 1)
    def _():
        inv_n = 1.0 / seq_len
        mean = sum_ref[...] * inv_n
        var = jnp.maximum(sq_ref[...] * inv_n - mean * mean, 0.0)
        gamma = gamma_ref[...].astype(jnp.float32)[:, None, :]
        beta = beta_ref[...].astype(jnp.float32)[:, None, :]
        scale = gamma * jax.lax.rsqrt(var + EPS)
        scale_ref[...] = scale
        shift_ref[...] = beta - mean * scale


def _apply_kernel(x1_ref, x2_ref, scale_ref, shift_ref, o_ref):
    x = x1_ref[...].astype(jnp.float32) + x2_ref[...].astype(jnp.float32)
    o_ref[...] = (x * scale_ref[...] + shift_ref[...]).astype(o_ref.dtype)


def _two_pass(input1, input2, gamma2d, beta2d, tile_elems, vmem_limit):
    B, S, D = input1.shape
    itemsize = jnp.dtype(input1.dtype).itemsize

    TD = D if D <= LANES else LANES
    TS = max(SUBLANES, (tile_elems // TD) // SUBLANES * SUBLANES)
    TS = min(TS, pl.cdiv(S, SUBLANES) * SUBLANES)
    TB = 1

    n_b, n_d, n_s = B, pl.cdiv(D, TD), pl.cdiv(S, TS)
    grid = (n_b, n_d, n_s)

    x_spec = pl.BlockSpec((TB, TS, TD), lambda b, d, s: (b, s, d))
    p_spec = pl.BlockSpec((1, TD), lambda b, d, s: (0, d))
    stat_spec = pl.BlockSpec((TB, 1, TD), lambda b, d, s: (b, 0, d))

    scale, shift = pl.pallas_call(
        functools.partial(_stats_kernel, seq_len=S, ts=TS),
        out_shape=(jax.ShapeDtypeStruct((B, 1, D), jnp.float32),
                   jax.ShapeDtypeStruct((B, 1, D), jnp.float32)),
        grid_spec=pltpu.PrefetchScalarGridSpec(
            num_scalar_prefetch=0,
            grid=grid,
            in_specs=[x_spec, x_spec, p_spec, p_spec],
            out_specs=[stat_spec, stat_spec],
            scratch_shapes=[pltpu.VMEM((TB, 1, TD), jnp.float32),
                            pltpu.VMEM((TB, 1, TD), jnp.float32)],
        ),
        compiler_params=pltpu.CompilerParams(
            dimension_semantics=("parallel", "parallel", "arbitrary"),
            vmem_limit_bytes=vmem_limit,
        ),
        cost_estimate=pl.CostEstimate(
            flops=4 * B * S * D,
            transcendentals=B * D,
            bytes_accessed=2 * B * S * D * itemsize,
        ),
    )(input1, input2, gamma2d, beta2d)

    out = pl.pallas_call(
        _apply_kernel,
        out_shape=jax.ShapeDtypeStruct((B, S, D), input1.dtype),
        grid_spec=pltpu.PrefetchScalarGridSpec(
            num_scalar_prefetch=0,
            grid=grid,
            in_specs=[x_spec, x_spec, stat_spec, stat_spec],
            out_specs=x_spec,
        ),
        compiler_params=pltpu.CompilerParams(
            dimension_semantics=("parallel", "parallel", "parallel"),
            vmem_limit_bytes=vmem_limit,
        ),
        cost_estimate=pl.CostEstimate(
            flops=4 * B * S * D,
            transcendentals=0,
            bytes_accessed=3 * B * S * D * itemsize,
        ),
    )(input1, input2, scale, shift)
    return out


# --------------------------------------------------------------------------
# Wrapper
# --------------------------------------------------------------------------
def add_and_instance_norm(input1, input2, gamma, beta, *, force_two_pass=False):
    """input1, input2: (B, S, D); gamma, beta: (D,). Returns (B, S, D)."""
    assert input1.shape == input2.shape
    B, S, D = input1.shape
    itemsize = jnp.dtype(input1.dtype).itemsize

    vmem_limit, two_tc, target_tile_bytes = _chip_config()

    # Per-grid-step VMEM model: 3 HBM streams x 2 pipeline buffers at the input
    # dtype, plus ~3 tile-sized f32 temporaries materialized inside the kernel.
    per_elem_vmem = 3 * 2 * itemsize + 3 * 4
    tile_elems = min(target_tile_bytes // itemsize,
                     max(1, int(0.75 * vmem_limit) // per_elem_vmem))

    # gamma/beta as 2-D (1, D) so their blocks are plain (1, TD) lane slabs.
    gamma2d = gamma.reshape(1, D)
    beta2d = beta.reshape(1, D)

    # Minimal channel-tile width the single-pass kernel can use: the whole D
    # when D <= 128, otherwise one 128-lane chunk.  A ragged tail D block only
    # costs a few masked store lanes -- no padding, no extra HBM round trips.
    min_td = D if D <= LANES else LANES
    if force_two_pass or S * min_td > tile_elems:
        # Long-sequence fallback: S-chunked two-pass (stats, then apply).
        return _two_pass(input1, input2, gamma2d, beta2d, tile_elems, vmem_limit)

    # ---- Single-pass tiling: whole S axis per block. -----------------------
    if S * D <= tile_elems:
        TD = D  # full channel dim in one block (always legal, even if D%128!=0)
    else:
        TD = max(LANES, (tile_elems // (S * LANES)) * LANES)
        TD = min(TD, pl.cdiv(D, LANES) * LANES)
    TB = min(B, max(1, tile_elems // (S * TD)))

    # v7x has 2 TensorCores: make sure at least one 'parallel' axis has >= 2
    # grid steps so both cores get work.  Single-TC chips (v5e/v6e) keep the
    # biggest tiles (fewest ~0.35us grid-step overheads).
    if two_tc and pl.cdiv(B, TB) * pl.cdiv(D, TD) < 2:
        if B >= 2:
            TB = pl.cdiv(B, 2)
        elif D >= 2 * LANES:
            TD = pl.cdiv(pl.cdiv(D, 2), LANES) * LANES

    n_b, n_d = pl.cdiv(B, TB), pl.cdiv(D, TD)

    # Prefer channel blocks outermost / batch innermost: the (1, TD) gamma/beta
    # block index is then unchanged across consecutive steps (no re-DMA), and a
    # >= 2-step parallel axis sits outermost for megacore sharding.  Fall back
    # to batch-outermost when only the batch axis has >= 2 steps.
    if n_d >= 2 or n_b < 2:
        grid = (n_d, n_b)
        x_map = lambda d, b: (b, 0, d)
        p_map = lambda d, b: (0, d)
    else:
        grid = (n_b, n_d)
        x_map = lambda b, d: (b, 0, d)
        p_map = lambda b, d: (0, d)

    x_spec = pl.BlockSpec((TB, S, TD), x_map)
    p_spec = pl.BlockSpec((1, TD), p_map)

    return pl.pallas_call(
        _add_instnorm_kernel,
        out_shape=jax.ShapeDtypeStruct((B, S, D), input1.dtype),
        grid_spec=pltpu.PrefetchScalarGridSpec(
            num_scalar_prefetch=0,
            grid=grid,
            in_specs=[x_spec, x_spec, p_spec, p_spec],
            out_specs=x_spec,
        ),
        compiler_params=pltpu.CompilerParams(
            dimension_semantics=("parallel", "parallel"),
            vmem_limit_bytes=vmem_limit,
        ),
        cost_estimate=pl.CostEstimate(
            flops=8 * B * S * D,
            transcendentals=B * D,
            bytes_accessed=3 * B * S * D * itemsize,
        ),
    )(input1, input2, gamma2d, beta2d)


def _reference(input1, input2, gamma, beta):
    x = input1.astype(jnp.float32) + input2.astype(jnp.float32)
    mean = jnp.mean(x, axis=1, keepdims=True)
    var = jnp.mean((x - mean) ** 2, axis=1, keepdims=True)
    y = (x - mean) * jax.lax.rsqrt(var + EPS)
    return (y * gamma[None, None, :] + beta[None, None, :]).astype(input1.dtype)


if __name__ == "__main__":
    # Small shapes consistent with the module: batch=2, seq=8, embedding_dim=32
    B, S, D = 2, 8, 32
    key = jax.random.PRNGKey(0)
    k1, k2, k3, k4 = jax.random.split(key, 4)

    input1 = jax.random.normal(k1, (B, S, D), dtype=jnp.float32)
    input2 = jax.random.normal(k2, (B, S, D), dtype=jnp.float32)

    # Deterministic affine params (PyTorch default would be ones/zeros; use
    # non-trivial deterministic values to exercise the affine path).
    gamma = 1.0 + 0.1 * jax.random.normal(k3, (D,), dtype=jnp.float32)
    beta = 0.1 * jax.random.normal(k4, (D,), dtype=jnp.float32)

    ref = _reference(input1, input2, gamma, beta)

    out = jax.block_until_ready(add_and_instance_norm(input1, input2, gamma, beta))
    assert out.shape == (B, S, D)
    assert jnp.allclose(out, ref, atol=1e-4, rtol=1e-4), "single-pass mismatch vs reference"

    # Also exercise the S-chunked two-pass fallback (used for very long
    # sequences) on the same small shapes.
    out2 = jax.block_until_ready(
        add_and_instance_norm(input1, input2, gamma, beta, force_two_pass=True))
    assert jnp.allclose(out2, ref, atol=1e-4, rtol=1e-4), "two-pass mismatch vs reference"

    print("KERNEL_OK")
</pallas_src>

<mosaic_0001>
module attributes {stable_mosaic.version = 11 : i64} {
  func.func @_add_instnorm_kernel(%arg0: i32, %arg1: i32, %arg2: memref<2x8x32xf32, #tpu.memory_space<vmem>>, %arg3: memref<2x8x32xf32, #tpu.memory_space<vmem>>, %arg4: memref<1x32xf32, #tpu.memory_space<vmem>>, %arg5: memref<1x32xf32, #tpu.memory_space<vmem>>, %arg6: memref<2x8x32xf32, #tpu.memory_space<vmem>>) attributes {dimension_semantics = [#tpu.dimension_semantics<parallel>, #tpu.dimension_semantics<parallel>], iteration_bounds = array<i64: 1, 1>, scalar_prefetch = 0 : i64, scratch_operands = 0 : i64, tpu.core_type = #tpu.core_type<tc>, window_params = [{transform_indices = @transform_0, window_bounds = array<i64: 2, 8, 32>}, {transform_indices = @transform_1, window_bounds = array<i64: 2, 8, 32>}, {transform_indices = @transform_2, window_bounds = array<i64: 1, 32>}, {transform_indices = @transform_3, window_bounds = array<i64: 1, 32>}, {transform_indices = @transform_4, window_bounds = array<i64: 2, 8, 32>}]} {
    %c0 = arith.constant 0 : index
    %c0_0 = arith.constant 0 : index
    %c0_1 = arith.constant 0 : index
    %0 = vector.load %arg2[%c0, %c0_0, %c0_1] : memref<2x8x32xf32, #tpu.memory_space<vmem>>, vector<2x8x32xf32>
    %c0_2 = arith.constant 0 : index
    %c0_3 = arith.constant 0 : index
    %c0_4 = arith.constant 0 : index
    %1 = vector.load %arg3[%c0_2, %c0_3, %c0_4] : memref<2x8x32xf32, #tpu.memory_space<vmem>>, vector<2x8x32xf32>
    %2 = arith.addf %0, %1 : vector<2x8x32xf32>
    %cst = arith.constant dense<0.000000e+00> : vector<2x32xf32>
    %3 = vector.multi_reduction <add>, %2, %cst [1] : vector<2x8x32xf32> to vector<2x32xf32>
    %4 = vector.shape_cast %3 : vector<2x32xf32> to vector<2x1x32xf32>
    %cst_5 = arith.constant 8.000000e+00 : f32
    %5 = vector.broadcast %cst_5 : f32 to vector<2x1x32xf32>
    %6 = arith.divf %4, %5 : vector<2x1x32xf32>
    %7 = vector.broadcast %6 : vector<2x1x32xf32> to vector<2x8x32xf32>
    %8 = arith.subf %2, %7 : vector<2x8x32xf32>
    %9 = arith.mulf %8, %8 : vector<2x8x32xf32>
    %cst_6 = arith.constant dense<0.000000e+00> : vector<2x32xf32>
    %10 = vector.multi_reduction <add>, %9, %cst_6 [1] : vector<2x8x32xf32> to vector<2x32xf32>
    %11 = vector.shape_cast %10 : vector<2x32xf32> to vector<2x1x32xf32>
    %cst_7 = arith.constant 8.000000e+00 : f32
    %12 = vector.broadcast %cst_7 : f32 to vector<2x1x32xf32>
    %13 = arith.divf %11, %12 : vector<2x1x32xf32>
    %c0_8 = arith.constant 0 : index
    %c0_9 = arith.constant 0 : index
    %14 = vector.load %arg4[%c0_8, %c0_9] : memref<1x32xf32, #tpu.memory_space<vmem>>, vector<1x32xf32>
    %15 = vector.shape_cast %14 : vector<1x32xf32> to vector<1x1x32xf32>
    %c0_10 = arith.constant 0 : index
    %c0_11 = arith.constant 0 : index
    %16 = vector.load %arg5[%c0_10, %c0_11] : memref<1x32xf32, #tpu.memory_space<vmem>>, vector<1x32xf32>
    %17 = vector.shape_cast %16 : vector<1x32xf32> to vector<1x1x32xf32>
    %cst_12 = arith.constant 9.99999974E-6 : f32
    %18 = vector.broadcast %cst_12 : f32 to vector<2x1x32xf32>
    %19 = arith.addf %13, %18 : vector<2x1x32xf32>
    %20 = math.rsqrt %19 : vector<2x1x32xf32>
    %21 = vector.broadcast %15 : vector<1x1x32xf32> to vector<2x1x32xf32>
    %22 = arith.mulf %21, %20 : vector<2x1x32xf32>
    %23 = arith.mulf %6, %22 : vector<2x1x32xf32>
    %24 = vector.broadcast %17 : vector<1x1x32xf32> to vector<2x1x32xf32>
    %25 = arith.subf %24, %23 : vector<2x1x32xf32>
    %26 = vector.broadcast %22 : vector<2x1x32xf32> to vector<2x8x32xf32>
    %27 = arith.mulf %2, %26 : vector<2x8x32xf32>
    %28 = vector.broadcast %25 : vector<2x1x32xf32> to vector<2x8x32xf32>
    %29 = arith.addf %27, %28 : vector<2x8x32xf32>
    %c0_13 = arith.constant 0 : index
    %c0_14 = arith.constant 0 : index
    %c0_15 = arith.constant 0 : index
    %30 = vector.load %arg6[%c0_13, %c0_14, %c0_15] : memref<2x8x32xf32, #tpu.memory_space<vmem>>, vector<2x8x32xf32>
    tpu.vector_store %arg6[%c0_13, %c0_14, %c0_15], %29 {strides = array<i32>} : memref<2x8x32xf32, #tpu.memory_space<vmem>>, vector<2x8x32xf32>,
    return
  }
  func.func @transform_0(%arg0: i32, %arg1: i32) -> (i32, i32, i32) {
    %c0_i32 = arith.constant 0 : i32
    %c0_i32_0 = arith.constant 0 : i32
    return %arg1, %c0_i32, %arg0 : i32, i32, i32
  }
  func.func @transform_1(%arg0: i32, %arg1: i32) -> (i32, i32, i32) {
    %c0_i32 = arith.constant 0 : i32
    %c0_i32_0 = arith.constant 0 : i32
    return %arg1, %c0_i32, %arg0 : i32, i32, i32
  }
  func.func @transform_2(%arg0: i32, %arg1: i32) -> (i32, i32) {
    %c0_i32 = arith.constant 0 : i32
    %c0_i32_0 = arith.constant 0 : i32
    return %c0_i32, %arg0 : i32, i32
  }
  func.func @transform_3(%arg0: i32, %arg1: i32) -> (i32, i32) {
    %c0_i32 = arith.constant 0 : i32
    %c0_i32_0 = arith.constant 0 : i32
    return %c0_i32, %arg0 : i32, i32
  }
  func.func @transform_4(%arg0: i32, %arg1: i32) -> (i32, i32, i32) {
    %c0_i32 = arith.constant 0 : i32
    %c0_i32_0 = arith.constant 0 : i32
    return %arg1, %c0_i32, %arg0 : i32, i32, i32
  }
}

</mosaic_0001>

<bundles_post_ra>
// kernel: tpu_custom_call.1
= control target key start
LH: loop header
LB: loop body
LE: loop exit
PB: predicated region body
PF: predicated region fallthrough
CT: control target
= control target key end

     0   :  { %9 = vsyncpa [#allocation3], 0  ;;  %s417_s0 = inlined_call_operand.hbm [shape: f32[2,8,32], index: 0, kind: input, shape index: {}]   ;;  %s418_s1 = inlined_call_operand.hbm [shape: f32[2,8,32], index: 1, kind: input, shape index: {}]   ;;  %s419_s2 = inlined_call_operand.hbm [shape: f32[1,32], index: 2, kind: input, shape index: {}]   ;;  %s420_s3 = inlined_call_operand.hbm [shape: f32[1,32], index: 3, kind: input, shape index: {}]   ;;  %s421_s4 = inlined_call_operand.hbm [shape: f32[2,8,32], index: 4, kind: output, shape index: {}]  }
   0x1   :  { %10 = vsyncpa [#allocation6], 0 }
   0x2   :  { %11 = vsyncpa [#allocation9], 0 }
   0x3   :  { %12 = vsyncpa [#allocation4], 0  ;;  %s303_s15 = smov [#allocation5]   ;;  %s304_s17 = smov [#allocation2]  }
   0x4   :  { %s30_s16 = sshll.u32 %s303_s15, 4  ;;  %s18_s18 = sshll.u32 %s304_s17, 4  ;;  %s31_s16 = int_to_ptr.vmem [resolvable:$true] %s30_s16  ;;  %s335_s18 = int_to_ptr.vmem [resolvable:$true] %s18_s18 }
   0x5   :  { %s185_s21 = scalar_lea.hbm %s418_s1, 256 }
   0x6   :  { %p186_p0 = scmp.ne.s32.totalorder %s418_s1, %s185_s21  ;;  %p189_p1 = scmp.lt.u32.totalorder %s185_s21, %s418_s1 }
   0x8   :  { %p191_p2 = pnand %p189_p1, %p186_p0 }
   0xa   :  { %194 = shalt.err (!%p191_p2)
}
   0xb   :  { %s195_s26 = scalar_lea.vmem %s31_s16, 256  ;;  %p200_p4 = scmp.lt.s32.totalorder %s31_s16, %s31_s16 }
   0xc   :  { %p196_p3 = scmp.ne.s32.totalorder %s31_s16, %s195_s26  ;;  %p201_p5 = scmp.lt.s32.totalorder %s195_s26, %s195_s26 }
   0xe   :  { %p202_p6 = por %p201_p5, %p200_p4 }
  0x10   :  { %p203_p7 = pnand %p202_p6, %p196_p3 }
  0x12   :  { %206 = shalt.err (!%p203_p7)
}
  0x13   :  { %s305_s27 = smov 128   ;;  %s306_s28 = smov 8  }
  0x14   :  { %36 = dma.hbm_to_vmem [thread:$0]  %s418_s1, 256, %s31_s16, [#allocation6], %s305_s27, %s305_s27, %s306_s28  }
  0x15   :  { %s207_s7 = scalar_lea.hbm %s417_s0, 256 }
  0x16   :  { %p208_p8 = scmp.ne.s32.totalorder %s417_s0, %s207_s7  ;;  %p211_p9 = scmp.lt.u32.totalorder %s207_s7, %s417_s0 }
  0x18   :  { %p213_p10 = pnand %p211_p9, %p208_p8 }
  0x1a   :  { %216 = shalt.err (!%p213_p10)
}
  0x1b   :  { %s217_s12 = scalar_lea.vmem %s335_s18, 256  ;;  %p222_p12 = scmp.lt.s32.totalorder %s335_s18, %s335_s18 }
  0x1c   :  { %p218_p11 = scmp.ne.s32.totalorder %s335_s18, %s217_s12  ;;  %p223_p13 = scmp.lt.s32.totalorder %s217_s12, %s217_s12 }
  0x1e   :  { %p224_p0 = por %p223_p13, %p222_p12 }
  0x20   :  { %p225_p1 = pnand %p224_p0, %p218_p11 }
  0x22   :  { %228 = shalt.err (!%p225_p1)
}
  0x23   :  { %24 = dma.hbm_to_vmem [thread:$0]  %s417_s0, 256, %s335_s18, [#allocation3], %s305_s27, %s305_s27, %s306_s28  }
  0x24   :  { %s307_s14 = smov [#allocation7]   ;;  %s308_s16 = smov [#allocation8]  }
  0x25   :  { %s43_s15 = sshll.u32 %s307_s14, 4  ;;  %s53_s17 = sshll.u32 %s308_s16, 4  ;;  %s44_s15 = int_to_ptr.vmem [resolvable:$true] %s43_s15  ;;  %s54_s17 = int_to_ptr.vmem [resolvable:$true] %s53_s17 }
  0x26   :  { %s229_s21 = scalar_lea.hbm %s419_s2, 16 }
  0x27   :  { %p230_p2 = scmp.ne.s32.totalorder %s419_s2, %s229_s21  ;;  %p233_p3 = scmp.lt.u32.totalorder %s229_s21, %s419_s2 }
  0x29   :  { %p235_p4 = pnand %p233_p3, %p230_p2 }
  0x2b   :  { %238 = shalt.err (!%p235_p4)
}
  0x2c   :  { %s239_s0 = scalar_lea.vmem %s44_s15, 16  ;;  %s243_s18 = scalar_lea.vmem %s44_s15, 32 }
  0x2d   :  { %p240_p5 = scmp.ne.s32.totalorder %s44_s15, %s239_s0  ;;  %p244_p6 = scmp.lt.s32.totalorder %s44_s15, %s44_s15 }
  0x2e   :  { %p245_p7 = scmp.lt.s32.totalorder %s243_s18, %s239_s0 }
  0x30   :  { %p246_p8 = por %p245_p7, %p244_p6 }
  0x32   :  { %p247_p9 = pnand %p246_p8, %p240_p5 }
  0x34   :  { %250 = shalt.err (!%p247_p9)
}
  0x35   :  { %46 = dma.hbm_to_vmem [thread:$0]  %s419_s2, 16, %s44_s15, [#allocation6]  }
  0x36   :  { %s251_s6 = scalar_lea.hbm %s420_s3, 16 }
  0x37   :  { %p252_p10 = scmp.ne.s32.totalorder %s420_s3, %s251_s6  ;;  %p255_p11 = scmp.lt.u32.totalorder %s251_s6, %s420_s3 }
  0x39   :  { %p257_p12 = pnand %p255_p11, %p252_p10 }
  0x3b   :  { %260 = shalt.err (!%p257_p12)
}
  0x3c   :  { %s261_s11 = scalar_lea.vmem %s54_s17, 16  ;;  %s265_s12 = scalar_lea.vmem %s54_s17, 32 }
  0x3d   :  { %p262_p13 = scmp.ne.s32.totalorder %s54_s17, %s261_s11  ;;  %p266_p0 = scmp.lt.s32.totalorder %s54_s17, %s54_s17 }
  0x3e   :  { %p267_p1 = scmp.lt.s32.totalorder %s265_s12, %s261_s11 }
  0x40   :  { %p268_p2 = por %p267_p1, %p266_p0 }
  0x42   :  { %p269_p3 = pnand %p268_p2, %p262_p13 }
  0x44   :  { %272 = shalt.err (!%p269_p3)
}
  0x45   :  { %56 = dma.hbm_to_vmem [thread:$0]  %s420_s3, 16, %s54_s17, [#allocation9]  }
  0x46   :  { %295 = dma.done.wait [#allocation3], 256  }
  0x47   :  { %296 = vsyncadd [#allocation3], 4294967040 }
  0x48   :  { %297 = dma.done.wait [#allocation6], 272  }
  0x49   :  { %298 = vsyncadd [#allocation6], 4294967024 }
  0x4a   :  { %299 = dma.done.wait [#allocation9], 16  }
  0x4b   :  { %300 = vsyncadd [#allocation9], 4294967280  ;;  %v69_v0 = vld [vmem:[#allocation2] sm:$0xff]  ;;  %v71_v1 = vld [vmem:[#allocation5] sm:$0xff]  ;;  %vm75_vm0 = vcmask 261120   ;;  %v127_v44 = vlaneseq  ;;  %s309_s3 = smov [#allocation10]  }
  0x4c   :  { %v73_v2 = vadd.f32 %v71_v1, %v69_v0  ;;  %v70_v3 = vld [vmem:[#allocation2 + $0x8] sm:$0xff]  ;;  %v72_v4 = vld [vmem:[#allocation5 + $0x8] sm:$0xff]  ;;  %v113_v46 = vld [vmem:[#allocation7] sm:$0x1]  ;;  %s160_s13 = sshll.u32 %s309_s3, 4  ;;  %s161_s13 = int_to_ptr.vmem [resolvable:$true] %s160_s13 }
  0x4d   :  { %v74_v5 = vadd.f32 %v72_v4, %v70_v3  ;;  %v128_v45 = vshrl.u32 %v127_v44, 7  ;;  %v114_v51 = vld [vmem:[#allocation8] sm:$0x1]  ;;  %s273_s14 = scalar_lea.vmem %s161_s13, 256  ;;  %p278_p5 = scmp.lt.s32.totalorder %s161_s13, %s161_s13 }
  0x4e   :  { %v76_v6 = vsel %vm75_vm0, %v73_v2, 0.0  ;;  %p274_p4 = scmp.ne.s32.totalorder %s161_s13, %s273_s14  ;;  %p279_p6 = scmp.lt.s32.totalorder %s273_s14, %s273_s14 }
  0x4f   :  { %v77_v7 = vrot.slane %v76_v6, 4  ;;  %v83_v8 = vsel %vm75_vm0, %v74_v5, 0.0  ;;  %v129_v47 = vsub.s32 0, %v128_v45 }
  0x50   :  { %v84_v9 = vrot.slane %v83_v8, 4  ;;  %p280_p7 = por %p279_p6, %p278_p5 }
  0x51   :  { %v78_v10 = vadd.f32 %v77_v7, %v76_v6 }
  0x52   :  { %v85_v11 = vadd.f32 %v84_v9, %v83_v8  ;;  %p281_p8 = pnand %p280_p7, %p274_p4 }
  0x53   :  { %v79_v12 = vrot.slane %v78_v10, 2 }
  0x54   :  { %v86_v13 = vrot.slane %v85_v11, 2 }
  0x55   :  { %v80_v14 = vadd.f32 %v79_v12, %v78_v10 }
  0x56   :  { %v87_v15 = vadd.f32 %v86_v13, %v85_v11 }
  0x57   :  { %v81_v16 = vrot.slane %v80_v14, 1 }
  0x58   :  { %v88_v17 = vrot.slane %v87_v15, 1 }
  0x59   :  { %v82_v18 = vadd.f32 %v81_v16, %v80_v14 }
  0x5a   :  { %v89_v19 = vadd.f32 %v88_v17, %v87_v15 }
  0x5b   :  { %v91_v20 = vmul.f32 0.125, %v82_v18 }
  0x5c   :  { %v92_v21 = vmul.f32 0.125, %v89_v19 }
  0x5d   :  { %v93_v22 = vsub.f32 %v73_v2, %v91_v20 }
  0x5e   :  { %v94_v23 = vsub.f32 %v74_v5, %v92_v21 }
  0x5f   :  { %v95_v24 = vmul.f32 %v93_v22, %v93_v22 }
  0x60   :  { %v96_v25 = vmul.f32 %v94_v23, %v94_v23 }
  0x61   :  { %v97_v26 = vsel %vm75_vm0, %v95_v24, 0.0 }
  0x62   :  { %v98_v27 = vrot.slane %v97_v26, 4  ;;  %v104_v28 = vsel %vm75_vm0, %v96_v25, 0.0 }
  0x63   :  { %v105_v29 = vrot.slane %v104_v28, 4 }
  0x64   :  { %v99_v30 = vadd.f32 %v98_v27, %v97_v26 }
  0x65   :  { %v106_v31 = vadd.f32 %v105_v29, %v104_v28 }
  0x66   :  { %v100_v32 = vrot.slane %v99_v30, 2 }
  0x67   :  { %v107_v33 = vrot.slane %v106_v31, 2 }
  0x68   :  { %v101_v34 = vadd.f32 %v100_v32, %v99_v30 }
  0x69   :  { %v108_v35 = vadd.f32 %v107_v33, %v106_v31 }
  0x6a   :  { %v102_v36 = vrot.slane %v101_v34, 1 }
  0x6b   :  { %v109_v37 = vrot.slane %v108_v35, 1 }
  0x6c   :  { %v103_v38 = vadd.f32 %v102_v36, %v101_v34 }
  0x6d   :  { %v110_v39 = vadd.f32 %v109_v37, %v108_v35 }
  0x6e   :  { %v111_v40 = vmul.f32 0.125, %v103_v38 }
  0x6f   :  { %v112_v41 = vmul.f32 0.125, %v110_v39 }
  0x70   :  { %v115_v42 = vadd.f32 1e-05, %v111_v40 }
  0x71   :  { %v116_v43 = vadd.f32 1e-05, %v112_v41 }
  0x72   :  { %181 = vrsqrt.f32 %v115_v42 }
  0x73   :  { %183 = vrsqrt.f32 %v116_v43 }
  0x7c   :  { %v182_v48 = vpop.eup %181 }
  0x7d   :  { %v184_v49 = vpop.eup %183  ;;  %v119_v50 = vmul.f32 %v182_v48, %v113_v46 }
  0x7e   :  { %v120_v52 = vmul.f32 %v184_v49, %v113_v46 }
  0x7f   :  { %v121_v53 = vmul.f32 %v119_v50, %v91_v20  ;;  %v130_v54 = vrot.slane %v119_v50, %v129_v47 }
  0x80   :  { %v122_v55 = vmul.f32 %v120_v52, %v92_v21  ;;  %v134_v56 = vrot.slane %v120_v52, %v129_v47 }
  0x81   :  { %v123_v57 = vsub.f32 %v114_v51, %v121_v53  ;;  %v137_v58 = vmul.f32 %v130_v54, %v73_v2 }
  0x82   :  { %v124_v59 = vsub.f32 %v114_v51, %v122_v55  ;;  %v138_v60 = vmul.f32 %v134_v56, %v74_v5 }
  0x83   :  { %v144_v61 = vrot.slane %v123_v57, %v129_v47 }
  0x84   :  { %v148_v62 = vrot.slane %v124_v59, %v129_v47 }
  0x85   :  { %v151_v63 = vadd.f32 %v144_v61, %v137_v58 }
  0x86   :  { %v152_v0 = vadd.f32 %v148_v62, %v138_v60 }
  0x87   :  { %153 = vst.msk [vmem:[#allocation10] sm:$0xff] %vm75_vm0, %v151_v63 }
  0x88   :  { %154 = vst.msk [vmem:[#allocation10 + $0x8] sm:$0xff] %vm75_vm0, %v152_v0 }
  0x89   :  { %284 = shalt.err (!%p281_p8)
}
  0x8a   :  { %s285_s17 = scalar_lea.hbm %s421_s4, 256 }
  0x8b   :  { %p286_p9 = scmp.ne.s32.totalorder %s421_s4, %s285_s17  ;;  %p289_p10 = scmp.lt.u32.totalorder %s285_s17, %s421_s4 }
  0x8d   :  { %p291_p11 = pnand %p289_p10, %p286_p9 }
  0x8f   :  { %294 = shalt.err (!%p291_p11)
}
  0x90   :  { %166 = dma.vmem_to_hbm [thread:$0]  %s161_s13, 256, %s421_s4, [#allocation4], %s305_s27, %s305_s27, %s306_s28  }
  0x91   :  { %301 = dma.done.wait [#allocation4], 256  }
  0x92   :  { %302 = vsyncadd [#allocation4], 4294967040 }
  0x93   :  { %170 = vsyncpa [#allocation3], 1 }
  0x94   :  { %171 = vsyncpa [#allocation6], 1 }
  0x95   :  { %172 = vsyncpa [#allocation9], 1 }
  0x96   :  { %173 = vsyncpa [#allocation4], 1 }

</bundles_post_ra>
